<compile_context>
chip_gen: v7x
topology: tpu7x:2x2x1
jax: 0.10.0
libtpu: 0.0.40
codegen_flags: <defaults>
</compile_context>

<pallas_src>
import functools

import jax
import jax.numpy as jnp
from jax.experimental import pallas as pl
from jax.experimental.pallas import tpu as pltpu

NEG_SLOPE = 0.01     # nn.LeakyReLU default
BN_EPS = 1e-5        # nn.BatchNorm1d default


def _leaky_relu(x):
    # 2-op (mul + max) form; equivalent to where(x>0, x, 0.01*x) for slope < 1.
    return jnp.maximum(x, NEG_SLOPE * x)


def _round_up(v, m):
    return (v + m - 1) // m * m


def _cdiv(a, b):
    return -(-a // b)


# --------------------------------------------------------------------------- #
# Kernel: one row tile of the fused encoder MLP.
# --------------------------------------------------------------------------- #
def vae_encoder_kernel(x_ref,
                       w1_ref, w2_ref, w3_ref, w4_ref, w5_ref, wh_ref,
                       b_ref, out_ref, *, bias_slices):
    """x_ref: [TM, Cin] bf16; w*_ref: [K, N] bf16; b_ref: [1, BTOT] f32 packed
    at 128-aligned lane offsets; out_ref: [TM, HEAD] f32 (lanes [0:2*latent] =
    mu|log_var, rest zero-padding)."""

    def dense(h_bf16, w_ref, sl, act):
        off, width = sl
        # bf16 operands on the MXU, f32 accumulate; bias + LeakyReLU in f32.
        y = jnp.dot(h_bf16, w_ref[...], preferred_element_type=jnp.float32)
        y = y + b_ref[:, off:off + width]
        if act:
            # Return bf16 so spilled inter-layer activations cost half the
            # VMEM store/load traffic and the next matmul needs no cast.
            return _leaky_relu(y).astype(jnp.bfloat16)
        return y

    h = x_ref[...]                                   # [TM, Cin] bf16
    h = dense(h, w1_ref, bias_slices[0], True)       # Cin -> 32
    h = dense(h, w2_ref, bias_slices[1], True)       # 32  -> 64
    h = dense(h, w3_ref, bias_slices[2], True)       # 64  -> 128 (BN folded in)
    h = dense(h, w4_ref, bias_slices[3], True)       # 128 -> 256
    h = dense(h, w5_ref, bias_slices[4], True)       # 256 -> 512
    out_ref[...] = dense(h, wh_ref, bias_slices[5], False)   # 512 -> mu|log_var


# --------------------------------------------------------------------------- #
# Parameter packing: BN folding (into the 64->128 layer), head fusion/padding,
# bf16 cast, lane-aligned bias packing.
# --------------------------------------------------------------------------- #
def _pack_params(params):
    # Eval-mode BN is a per-feature affine applied AFTER encoder1's LeakyReLU
    # and BEFORE the 64->128 Linear:  BN(h) = h*s + t.
    #   BN(h) @ W3 + b3 = h @ (s[:,None] * W3) + (t @ W3 + b3)
    s = params["bn_gamma"] * jax.lax.rsqrt(params["bn_var"] + BN_EPS)   # [1, 64]
    t = params["bn_beta"] - params["bn_mean"] * s                        # [1, 64]
    w3f = params["w3"] * s.reshape(-1, 1)                                # [64, 128]
    b3f = t @ params["w3"] + params["b3"]                                # [1, 128]

    wh = jnp.concatenate([params["wmu"], params["wvar"]], axis=1)        # [512, 2*latent]
    bh = jnp.concatenate([params["bmu"], params["bvar"]], axis=1)
    head_w = _round_up(wh.shape[1], 128)
    pad = head_w - wh.shape[1]
    if pad:
        wh = jnp.pad(wh, ((0, 0), (0, pad)))
        bh = jnp.pad(bh, ((0, 0), (0, pad)))

    weights = [params["w1"], params["w2"], w3f, params["w4"], params["w5"], wh]
    biases = [params["b1"], params["b2"], b3f, params["b4"], params["b5"], bh]

    # Pack biases at 128-aligned lane offsets into a single [1, BTOT] array.
    slices, chunks, off = [], [], 0
    for b in biases:
        width = b.shape[1]
        slices.append((off, width))
        chunks.append(b)
        pad_w = _round_up(width, 128) - width
        if pad_w:
            chunks.append(jnp.zeros((1, pad_w), jnp.float32))
        off += _round_up(width, 128)
    b_packed = jnp.concatenate(chunks, axis=1)

    weights_bf16 = [w.astype(jnp.bfloat16) for w in weights]
    return weights_bf16, b_packed, tuple(slices), head_w


# --------------------------------------------------------------------------- #
# Wrapper
# --------------------------------------------------------------------------- #
@functools.partial(jax.jit, static_argnames=("latent_dim",))
def vae_encode(x, params, latent_dim):
    """x: [N, L, C_in] float32 -> (mu, log_var), each [N, L, latent_dim]."""
    N, L, C = x.shape
    M = N * L
    x2d = x.reshape(M, C).astype(jnp.bfloat16)   # bf16 input: halves input DMA

    weights, b_packed, bias_slices, head_w = _pack_params(params)

    # Row tile: target 1024 rows to amortize per-grid-step overhead, but keep
    # an even number of >=2 grid steps so the "parallel" axis can shard across
    # both v7x TensorCores.  Multiple of 16 for bf16 sublane packing.
    TM_TARGET = 1024
    M16 = _round_up(M, 16)
    num_tiles = max(2, _cdiv(M16, TM_TARGET))
    if num_tiles % 2:
        num_tiles += 1
    TM = _round_up(_cdiv(M16, num_tiles), 16)
    M_pad = TM * num_tiles
    if M_pad != M:
        x2d = jnp.pad(x2d, ((0, M_pad - M), (0, 0)))
    grid = (num_tiles,)

    dims = [(w.shape[0], w.shape[1]) for w in weights]
    flops = 2 * M_pad * sum(k * n for k, n in dims)
    bytes_accessed = (x2d.size * 2
                      + sum(w.size * 2 for w in weights)
                      + b_packed.size * 4
                      + M_pad * head_w * 4)

    x_spec = pl.BlockSpec((TM, C), lambda i: (i, 0))
    w_specs = [pl.BlockSpec(w.shape, lambda i: (0, 0)) for w in weights]
    b_spec = pl.BlockSpec(b_packed.shape, lambda i: (0, 0))
    out_spec = pl.BlockSpec((TM, head_w), lambda i: (i, 0))

    kernel = functools.partial(vae_encoder_kernel, bias_slices=bias_slices)

    out = pl.pallas_call(
        kernel,
        out_shape=jax.ShapeDtypeStruct((M_pad, head_w), jnp.float32),
        grid=grid,
        in_specs=[x_spec] + w_specs + [b_spec],
        out_specs=out_spec,
        compiler_params=pltpu.CompilerParams(
            dimension_semantics=("parallel",),
            vmem_limit_bytes=32 * 1024 * 1024),   # above v5e's 16 MiB default
        cost_estimate=pl.CostEstimate(
            flops=flops, transcendentals=0, bytes_accessed=bytes_accessed),
    )(x2d, *weights, b_packed)

    mu = out[:M, :latent_dim].reshape(N, L, latent_dim)
    log_var = out[:M, latent_dim:2 * latent_dim].reshape(N, L, latent_dim)
    return mu, log_var


# --------------------------------------------------------------------------- #
# Parameters & references
# --------------------------------------------------------------------------- #
def init_params(key, in_channels, latent_dim, hidden_dims):
    """Deterministic synthetic parameters. Linear weights stored [in, out]."""
    dims = [in_channels] + list(hidden_dims)
    params = {}
    keys = jax.random.split(key, 18)
    ki = 0
    for idx in range(len(hidden_dims)):
        fan_in, fan_out = dims[idx], dims[idx + 1]
        params[f"w{idx + 1}"] = jax.random.normal(
            keys[ki], (fan_in, fan_out), jnp.float32) * (1.0 / jnp.sqrt(fan_in))
        params[f"b{idx + 1}"] = jax.random.normal(
            keys[ki + 1], (1, fan_out), jnp.float32) * 0.01
        ki += 2
    bn_dim = hidden_dims[len(hidden_dims) // 2 - 1]
    params["bn_gamma"] = 1.0 + 0.1 * jax.random.normal(keys[ki], (1, bn_dim), jnp.float32)
    params["bn_beta"] = 0.1 * jax.random.normal(keys[ki + 1], (1, bn_dim), jnp.float32)
    params["bn_mean"] = 0.05 * jax.random.normal(keys[ki + 2], (1, bn_dim), jnp.float32)
    params["bn_var"] = 1.0 + 0.1 * jax.random.uniform(keys[ki + 3], (1, bn_dim), jnp.float32)
    ki += 4
    last = hidden_dims[-1]
    params["wmu"] = jax.random.normal(keys[ki], (last, latent_dim), jnp.float32) * (1.0 / jnp.sqrt(last))
    params["bmu"] = jax.random.normal(keys[ki + 1], (1, latent_dim), jnp.float32) * 0.01
    params["wvar"] = jax.random.normal(keys[ki + 2], (last, latent_dim), jnp.float32) * (1.0 / jnp.sqrt(last))
    params["bvar"] = jax.random.normal(keys[ki + 3], (1, latent_dim), jnp.float32) * 0.01
    return params


def _reference_packed(x2d, weights, b_packed, bias_slices, latent_dim):
    """Pure-JAX mirror of the kernel math (same bf16 operand / f32-accumulate /
    bf16 inter-layer activation path)."""
    h = x2d.astype(jnp.bfloat16)
    n_layers = len(weights)
    for li, (w, (off, width)) in enumerate(zip(weights, bias_slices)):
        y = jnp.dot(h, w, preferred_element_type=jnp.float32)
        y = y + b_packed[:, off:off + width]
        if li < n_layers - 1:
            h = _leaky_relu(y).astype(jnp.bfloat16)
        else:
            h = y
    return h[:, :latent_dim], h[:, latent_dim:2 * latent_dim]


def _reference_f32(x, params):
    """Full-precision reference of the eval-mode PyTorch forward."""
    N, L, C = x.shape
    h = x.reshape(N * L, C)
    h = _leaky_relu(h @ params["w1"] + params["b1"])
    h = _leaky_relu(h @ params["w2"] + params["b2"])
    h = (h - params["bn_mean"]) / jnp.sqrt(params["bn_var"] + BN_EPS) \
        * params["bn_gamma"] + params["bn_beta"]
    h = _leaky_relu(h @ params["w3"] + params["b3"])
    h = _leaky_relu(h @ params["w4"] + params["b4"])
    h = _leaky_relu(h @ params["w5"] + params["b5"])
    mu = h @ params["wmu"] + params["bmu"]
    lv = h @ params["wvar"] + params["bvar"]
    latent = mu.shape[-1]
    return mu.reshape(N, L, latent), lv.reshape(N, L, latent)


if __name__ == "__main__":
    # ConditionalVAE feeds the encoder in_channels + 1 features (data channels
    # + the class-embedding channel); keep shapes small for the demo.
    in_channels = 5
    latent_dim = 16
    hidden_dims = [32, 64, 128, 256, 512]
    N, L = 2, 8

    key = jax.random.PRNGKey(0)
    kx, kp = jax.random.split(key)
    x = jax.random.normal(kx, (N, L, in_channels), jnp.float32)
    params = init_params(kp, in_channels, latent_dim, hidden_dims)

    mu, log_var = vae_encode(x, params, latent_dim)
    jax.block_until_ready((mu, log_var))

    assert mu.shape == (N, L, latent_dim) and log_var.shape == (N, L, latent_dim)

    # Exact-path check (same bf16/f32 dtype path as the kernel).
    weights, b_packed, bias_slices, _ = _pack_params(params)
    mu_p, lv_p = _reference_packed(x.reshape(N * L, in_channels),
                                   weights, b_packed, bias_slices, latent_dim)
    assert jnp.allclose(mu, mu_p.reshape(N, L, latent_dim), atol=2e-3, rtol=2e-3)
    assert jnp.allclose(log_var, lv_p.reshape(N, L, latent_dim), atol=2e-3, rtol=2e-3)

    # Sanity check against the full-f32 PyTorch-equivalent reference
    # (looser tolerance because matmul operands are bf16 on the MXU).
    mu_ref, lv_ref = _reference_f32(x, params)
    assert jnp.allclose(mu, mu_ref, atol=5e-2, rtol=5e-2)
    assert jnp.allclose(log_var, lv_ref, atol=5e-2, rtol=5e-2)

    print("KERNEL_OK")
</pallas_src>

<mosaic_0001>
module attributes {stable_mosaic.version = 11 : i64} {
  func.func @vae_encoder_kernel(%arg0: i32, %arg1: memref<16x5xbf16, #tpu.memory_space<vmem>>, %arg2: memref<5x32xbf16, #tpu.memory_space<vmem>>, %arg3: memref<32x64xbf16, #tpu.memory_space<vmem>>, %arg4: memref<64x128xbf16, #tpu.memory_space<vmem>>, %arg5: memref<128x256xbf16, #tpu.memory_space<vmem>>, %arg6: memref<256x512xbf16, #tpu.memory_space<vmem>>, %arg7: memref<512x128xbf16, #tpu.memory_space<vmem>>, %arg8: memref<1x1280xf32, #tpu.memory_space<vmem>>, %arg9: memref<16x128xf32, #tpu.memory_space<vmem>>) attributes {dimension_semantics = [#tpu.dimension_semantics<parallel>], iteration_bounds = array<i64: 2>, scalar_prefetch = 0 : i64, scratch_operands = 0 : i64, tpu.core_type = #tpu.core_type<tc>, window_params = [{transform_indices = @transform_0, window_bounds = array<i64: 16, 5>}, {pipeline_mode = #tpu.pipeline_mode<synchronous>, transform_indices = @transform_1, window_bounds = array<i64: 5, 32>}, {pipeline_mode = #tpu.pipeline_mode<synchronous>, transform_indices = @transform_2, window_bounds = array<i64: 32, 64>}, {pipeline_mode = #tpu.pipeline_mode<synchronous>, transform_indices = @transform_3, window_bounds = array<i64: 64, 128>}, {pipeline_mode = #tpu.pipeline_mode<synchronous>, transform_indices = @transform_4, window_bounds = array<i64: 128, 256>}, {pipeline_mode = #tpu.pipeline_mode<synchronous>, transform_indices = @transform_5, window_bounds = array<i64: 256, 512>}, {pipeline_mode = #tpu.pipeline_mode<synchronous>, transform_indices = @transform_6, window_bounds = array<i64: 512, 128>}, {pipeline_mode = #tpu.pipeline_mode<synchronous>, transform_indices = @transform_7, window_bounds = array<i64: 1, 1280>}, {transform_indices = @transform_8, window_bounds = array<i64: 16, 128>}]} {
    %c0 = arith.constant 0 : index
    %c0_0 = arith.constant 0 : index
    %0 = vector.load %arg1[%c0, %c0_0] : memref<16x5xbf16, #tpu.memory_space<vmem>>, vector<16x5xbf16>
    %c0_1 = arith.constant 0 : index
    %c0_2 = arith.constant 0 : index
    %1 = vector.load %arg2[%c0_1, %c0_2] : memref<5x32xbf16, #tpu.memory_space<vmem>>, vector<5x32xbf16>
    %cst = arith.constant dense<0.000000e+00> : vector<16x32xf32>
    %2 = tpu.matmul %0, %1, %cst {dimension_numbers = #tpu.dot_dimension_numbers<[1], [0], [0], [1], [0, 0, 1, 1], [], []>} : vector<16x5xbf16>, vector<5x32xbf16>, vector<16x32xf32> -> vector<16x32xf32>
    %c0_3 = arith.constant 0 : index
    %c0_4 = arith.constant 0 : index
    %3 = vector.load %arg8[%c0_3, %c0_4] : memref<1x1280xf32, #tpu.memory_space<vmem>>, vector<1x32xf32>
    %4 = vector.broadcast %3 : vector<1x32xf32> to vector<16x32xf32>
    %5 = arith.addf %2, %4 : vector<16x32xf32>
    %cst_5 = arith.constant 0.00999999977 : f32
    %6 = vector.broadcast %cst_5 : f32 to vector<16x32xf32>
    %7 = arith.mulf %6, %5 : vector<16x32xf32>
    %8 = arith.maximumf %5, %7 : vector<16x32xf32>
    %9 = arith.truncf %8 : vector<16x32xf32> to vector<16x32xbf16>
    %c0_6 = arith.constant 0 : index
    %c0_7 = arith.constant 0 : index
    %10 = vector.load %arg3[%c0_6, %c0_7] : memref<32x64xbf16, #tpu.memory_space<vmem>>, vector<32x64xbf16>
    %cst_8 = arith.constant dense<0.000000e+00> : vector<16x64xf32>
    %11 = tpu.matmul %9, %10, %cst_8 {dimension_numbers = #tpu.dot_dimension_numbers<[1], [0], [0], [1], [0, 0, 1, 1], [], []>} : vector<16x32xbf16>, vector<32x64xbf16>, vector<16x64xf32> -> vector<16x64xf32>
    %c0_9 = arith.constant 0 : index
    %c128 = arith.constant 128 : index
    %12 = vector.load %arg8[%c0_9, %c128] : memref<1x1280xf32, #tpu.memory_space<vmem>>, vector<1x64xf32>
    %13 = vector.broadcast %12 : vector<1x64xf32> to vector<16x64xf32>
    %14 = arith.addf %11, %13 : vector<16x64xf32>
    %cst_10 = arith.constant 0.00999999977 : f32
    %15 = vector.broadcast %cst_10 : f32 to vector<16x64xf32>
    %16 = arith.mulf %15, %14 : vector<16x64xf32>
    %17 = arith.maximumf %14, %16 : vector<16x64xf32>
    %18 = arith.truncf %17 : vector<16x64xf32> to vector<16x64xbf16>
    %c0_11 = arith.constant 0 : index
    %c0_12 = arith.constant 0 : index
    %19 = vector.load %arg4[%c0_11, %c0_12] : memref<64x128xbf16, #tpu.memory_space<vmem>>, vector<64x128xbf16>
    %cst_13 = arith.constant dense<0.000000e+00> : vector<16x128xf32>
    %20 = tpu.matmul %18, %19, %cst_13 {dimension_numbers = #tpu.dot_dimension_numbers<[1], [0], [0], [1], [0, 0, 1, 1], [], []>} : vector<16x64xbf16>, vector<64x128xbf16>, vector<16x128xf32> -> vector<16x128xf32>
    %c0_14 = arith.constant 0 : index
    %c256 = arith.constant 256 : index
    %21 = vector.load %arg8[%c0_14, %c256] : memref<1x1280xf32, #tpu.memory_space<vmem>>, vector<1x128xf32>
    %22 = vector.broadcast %21 : vector<1x128xf32> to vector<16x128xf32>
    %23 = arith.addf %20, %22 : vector<16x128xf32>
    %cst_15 = arith.constant 0.00999999977 : f32
    %24 = vector.broadcast %cst_15 : f32 to vector<16x128xf32>
    %25 = arith.mulf %24, %23 : vector<16x128xf32>
    %26 = arith.maximumf %23, %25 : vector<16x128xf32>
    %27 = arith.truncf %26 : vector<16x128xf32> to vector<16x128xbf16>
    %c0_16 = arith.constant 0 : index
    %c0_17 = arith.constant 0 : index
    %28 = vector.load %arg5[%c0_16, %c0_17] : memref<128x256xbf16, #tpu.memory_space<vmem>>, vector<128x256xbf16>
    %cst_18 = arith.constant dense<0.000000e+00> : vector<16x256xf32>
    %29 = tpu.matmul %27, %28, %cst_18 {dimension_numbers = #tpu.dot_dimension_numbers<[1], [0], [0], [1], [0, 0, 1, 1], [], []>} : vector<16x128xbf16>, vector<128x256xbf16>, vector<16x256xf32> -> vector<16x256xf32>
    %c0_19 = arith.constant 0 : index
    %c384 = arith.constant 384 : index
    %30 = vector.load %arg8[%c0_19, %c384] : memref<1x1280xf32, #tpu.memory_space<vmem>>, vector<1x256xf32>
    %31 = vector.broadcast %30 : vector<1x256xf32> to vector<16x256xf32>
    %32 = arith.addf %29, %31 : vector<16x256xf32>
    %cst_20 = arith.constant 0.00999999977 : f32
    %33 = vector.broadcast %cst_20 : f32 to vector<16x256xf32>
    %34 = arith.mulf %33, %32 : vector<16x256xf32>
    %35 = arith.maximumf %32, %34 : vector<16x256xf32>
    %36 = arith.truncf %35 : vector<16x256xf32> to vector<16x256xbf16>
    %c0_21 = arith.constant 0 : index
    %c0_22 = arith.constant 0 : index
    %37 = vector.load %arg6[%c0_21, %c0_22] : memref<256x512xbf16, #tpu.memory_space<vmem>>, vector<256x512xbf16>
    %cst_23 = arith.constant dense<0.000000e+00> : vector<16x512xf32>
    %38 = tpu.matmul %36, %37, %cst_23 {dimension_numbers = #tpu.dot_dimension_numbers<[1], [0], [0], [1], [0, 0, 1, 1], [], []>} : vector<16x256xbf16>, vector<256x512xbf16>, vector<16x512xf32> -> vector<16x512xf32>
    %c0_24 = arith.constant 0 : index
    %c640 = arith.constant 640 : index
    %39 = vector.load %arg8[%c0_24, %c640] : memref<1x1280xf32, #tpu.memory_space<vmem>>, vector<1x512xf32>
    %40 = vector.broadcast %39 : vector<1x512xf32> to vector<16x512xf32>
    %41 = arith.addf %38, %40 : vector<16x512xf32>
    %cst_25 = arith.constant 0.00999999977 : f32
    %42 = vector.broadcast %cst_25 : f32 to vector<16x512xf32>
    %43 = arith.mulf %42, %41 : vector<16x512xf32>
    %44 = arith.maximumf %41, %43 : vector<16x512xf32>
    %45 = arith.truncf %44 : vector<16x512xf32> to vector<16x512xbf16>
    %c0_26 = arith.constant 0 : index
    %c0_27 = arith.constant 0 : index
    %46 = vector.load %arg7[%c0_26, %c0_27] : memref<512x128xbf16, #tpu.memory_space<vmem>>, vector<512x128xbf16>
    %cst_28 = arith.constant dense<0.000000e+00> : vector<16x128xf32>
    %47 = tpu.matmul %45, %46, %cst_28 {dimension_numbers = #tpu.dot_dimension_numbers<[1], [0], [0], [1], [0, 0, 1, 1], [], []>} : vector<16x512xbf16>, vector<512x128xbf16>, vector<16x128xf32> -> vector<16x128xf32>
    %c0_29 = arith.constant 0 : index
    %c1152 = arith.constant 1152 : index
    %48 = vector.load %arg8[%c0_29, %c1152] : memref<1x1280xf32, #tpu.memory_space<vmem>>, vector<1x128xf32>
    %49 = vector.broadcast %48 : vector<1x128xf32> to vector<16x128xf32>
    %50 = arith.addf %47, %49 : vector<16x128xf32>
    %c0_30 = arith.constant 0 : index
    %c0_31 = arith.constant 0 : index
    %51 = vector.load %arg9[%c0_30, %c0_31] : memref<16x128xf32, #tpu.memory_space<vmem>>, vector<16x128xf32>
    tpu.vector_store %arg9[%c0_30, %c0_31], %50 {strides = array<i32>} : memref<16x128xf32, #tpu.memory_space<vmem>>, vector<16x128xf32>,
    return
  }
  func.func @transform_0(%arg0: i32) -> (i32, i32) {
    %c0_i32 = arith.constant 0 : i32
    %c0_i32_0 = arith.constant 0 : i32
    return %arg0, %c0_i32 : i32, i32
  }
  func.func @transform_1(%arg0: i32) -> (i32, i32) {
    %c0_i32 = arith.constant 0 : i32
    %c0_i32_0 = arith.constant 0 : i32
    %c0_i32_1 = arith.constant 0 : i32
    return %c0_i32, %c0_i32_0 : i32, i32
  }
  func.func @transform_2(%arg0: i32) -> (i32, i32) {
    %c0_i32 = arith.constant 0 : i32
    %c0_i32_0 = arith.constant 0 : i32
    %c0_i32_1 = arith.constant 0 : i32
    return %c0_i32, %c0_i32_0 : i32, i32
  }
  func.func @transform_3(%arg0: i32) -> (i32, i32) {
    %c0_i32 = arith.constant 0 : i32
    %c0_i32_0 = arith.constant 0 : i32
    %c0_i32_1 = arith.constant 0 : i32
    return %c0_i32, %c0_i32_0 : i32, i32
  }
  func.func @transform_4(%arg0: i32) -> (i32, i32) {
    %c0_i32 = arith.constant 0 : i32
    %c0_i32_0 = arith.constant 0 : i32
    %c0_i32_1 = arith.constant 0 : i32
    return %c0_i32, %c0_i32_0 : i32, i32
  }
  func.func @transform_5(%arg0: i32) -> (i32, i32) {
    %c0_i32 = arith.constant 0 : i32
    %c0_i32_0 = arith.constant 0 : i32
    %c0_i32_1 = arith.constant 0 : i32
    return %c0_i32, %c0_i32_0 : i32, i32
  }
  func.func @transform_6(%arg0: i32) -> (i32, i32) {
    %c0_i32 = arith.constant 0 : i32
    %c0_i32_0 = arith.constant 0 : i32
    %c0_i32_1 = arith.constant 0 : i32
    return %c0_i32, %c0_i32_0 : i32, i32
  }
  func.func @transform_7(%arg0: i32) -> (i32, i32) {
    %c0_i32 = arith.constant 0 : i32
    %c0_i32_0 = arith.constant 0 : i32
    %c0_i32_1 = arith.constant 0 : i32
    return %c0_i32, %c0_i32_0 : i32, i32
  }
  func.func @transform_8(%arg0: i32) -> (i32, i32) {
    %c0_i32 = arith.constant 0 : i32
    %c0_i32_0 = arith.constant 0 : i32
    return %arg0, %c0_i32 : i32, i32
  }
}

</mosaic_0001>

<bundles_post_ra>
// kernel: vae_encode.1
= control target key start
LH: loop header
LB: loop body
LE: loop exit
PB: predicated region body
PF: predicated region fallthrough
CT: control target
= control target key end

     0   :  { %s2065_s27 = smov 0   ;;  %s2478_s0 = inlined_call_operand.vmem [shape: bf16[32,5], index: 0, kind: input, shape index: {}]   ;;  %s2479_s1 = inlined_call_operand.vmem [shape: bf16[5,32], index: 1, kind: input, shape index: {}]   ;;  %s2480_s2 = inlined_call_operand.vmem [shape: bf16[32,64], index: 2, kind: input, shape index: {}]   ;;  %s2481_s3 = inlined_call_operand.vmem [shape: bf16[64,128], index: 3, kind: input, shape index: {}]   ;;  %s2482_s4 = inlined_call_operand.vmem [shape: bf16[128,256], index: 4, kind: input, shape index: {}]   ;;  %s2483_s5 = inlined_call_operand.vmem [shape: bf16[256,512], index: 5, kind: input, shape index: {}]   ;;  %s2484_s6 = inlined_call_operand.vmem [shape: bf16[512,128], index: 6, kind: input, shape index: {}]   ;;  %s2485_s7 = inlined_call_operand.vmem [shape: f32[1,1280], index: 7, kind: input, shape index: {}]   ;;  %s2486_s8 = inlined_call_operand.vmem [shape: f32[32,128], index: 8, kind: output, shape index: {}]  }
   0x1 LB: > { %s1620_s28 = sadd.s32 4294967295, %s2014_s27   ;;  %p1624_p0 = scmp.ge.s32.totalorder %s2014_s27, 1  ;;  %s2014_s27 = sphi %s2065_s27, %s18_s27  }
   0x2   : > { %p263_p1 = scmp.lt.s32.totalorder %s2014_s27, 3 }
   0x4   : > { %p264_p2 = pnand %p1624_p0, %p263_p1 }
   0x5   : > { %v312_v0 = vld [vmem:[%s2479_s1] sm:$0x7] (!%p264_p2)  ;;  %vm329_vm0 = vcmask (!%p264_p2), 1041408   ;;  %vm330_vm1 = vcmask (!%p264_p2), 1042432   ;;  %v2016_v1 = vmov (!%p264_p2), 0.0   ;;  %v2017_v2 = vmov (!%p264_p2), 65535  }
   0x6   : > { %267 = sbr.rel (%p264_p2) target bundleno = 1353 (0x549), region = 52  ;;  %1811 = vmatprep.subr.bf16.mxu0 (!%p264_p2), %v2016_v1  ;;  %v331_v3 = vsel (!%p264_p2), %vm329_vm0, 4294967295, %v2017_v2  ;;  %s1625_s9 = sshll.u32 (!%p264_p2), %s1620_s28, 1  ;;  %vm2018_vm2 = vmmov (!%p264_p2), 0   ;;  %vm325_vm3 = vcmask (!%p264_p2), 39936   ;;  %v1850_v7 = vld [vmem:[%s2480_s2] sm:$0xff] (!%p264_p2)  }
   0x7   : > { %v332_v4 = vsel (!%p264_p2), %vm330_vm1, %v331_v3, 0  ;;  %1813 = vmatprep.mubr.msk.bf16.mxu0 (!%p264_p2), %vm2018_vm2, %v2016_v1  ;;  %p298_p3 = scmp.lt.s32.totalorder (!%p264_p2), %s1625_s9, 3  ;;  %v1851_v8 = vld [vmem:[%s2480_s2 + $0x8] sm:$0xff] (!%p264_p2)   ;;  %v1629_v9 = vld [vmem:[%s2485_s7] ss:$0 sm:$0xff] (!%p264_p2)  ;;  %vm405_vm4 = vcmask (!%p264_p2), 261120  }
   0x8   : > { %v334_v5 = vand.u32 (!%p264_p2), %v332_v4, %v312_v0  ;;  %v1852_v20 = vld [vmem:[%s2481_s3] sm:$0xff] (!%p264_p2)   ;;  %v1853_v22 = vld [vmem:[%s2481_s3 + $0x8] sm:$0xff] (!%p264_p2)   ;;  %v1854_v23 = vld [vmem:[%s2481_s3 + $0x10] sm:$0xff] (!%p264_p2)   ;;  %vm494_vm5 = vcmask (!%p264_p2), 523264   ;;  %v2019_v53 = vmov (!%p264_p2), 0  }
   0x9   : > { %v1855_v24 = vld [vmem:[%s2481_s3 + $0x18] sm:$0xff] (!%p264_p2)   ;;  %v1856_v25 = vld [vmem:[%s2482_s4 + $0x4] ss:$8 sps:$4 sm:$0xff] (!%p264_p2)   ;;  %v1858_v26 = vld [vmem:[%s2482_s4] ss:$8 sps:$4 sm:$0xff] (!%p264_p2)   ;;  %684 = vmatprep.mubr.bf16.mxu1 (!%p264_p2), %v2019_v53 }
   0xa   : > { %1812 = vmatpush3.bf16.msra.mxu0 (!%p264_p2), %v334_v5  ;;  %v1859_v27 = vld [vmem:[%s2482_s4 + $0x14] ss:$8 sps:$4 sm:$0xff] (!%p264_p2)   ;;  %652 = vmatprep.subr.bf16.mxu1 (!%p264_p2), %v1856_v25  ;;  %v1861_v28 = vld [vmem:[%s2482_s4 + $0x10] ss:$8 sps:$4 sm:$0xff] (!%p264_p2)   ;;  %v1862_v29 = vld [vmem:[%s2482_s4 + $0x24] ss:$8 sps:$4 sm:$0xff] (!%p264_p2)  }
   0xb   : > { %1817 = vmatprep.subr.bf16.mxu0 (!%p264_p2), %v2016_v1  ;;  %653 = vmatpush1.bf16.msra.mxu1 (!%p264_p2), %v1858_v26  ;;  %v1864_v30 = vld [vmem:[%s2482_s4 + $0x20] ss:$8 sps:$4 sm:$0xff] (!%p264_p2)   ;;  %v1865_v31 = vld [vmem:[%s2482_s4 + $0x34] ss:$8 sps:$4 sm:$0xff] (!%p264_p2)   ;;  %v1867_v32 = vld [vmem:[%s2482_s4 + $0x30] ss:$8 sps:$4 sm:$0xff] (!%p264_p2)  }
   0xc   : > { %654 = vmatprep.subr.bf16.mxu1 (!%p264_p2), %v1859_v27  ;;  %v1868_v33 = vld [vmem:[%s2482_s4 + $0x44] ss:$8 sps:$4 sm:$0xff] (!%p264_p2)   ;;  %v1870_v34 = vld [vmem:[%s2482_s4 + $0x40] ss:$8 sps:$4 sm:$0xff] (!%p264_p2)   ;;  %v1871_v35 = vld [vmem:[%s2482_s4 + $0x54] ss:$8 sps:$4 sm:$0xff] (!%p264_p2)  }
   0xd   : > { %s2488_s9 = smov (!%p298_p3, %s1625_s9), 3  ;;  %v1632_v36 = vld [vmem:[%s2485_s7 + $0x1] ss:$0 sm:$0xff]  ;;  %v1873_v48 = vld [vmem:[%s2482_s4 + $0x50] ss:$8 sps:$4 sm:$0xff]  }
   0xe   : > { %s1626_s10 = sshll.u32 %s2488_s9, 2  ;;  %v1874_v49 = vld [vmem:[%s2482_s4 + $0x64] ss:$8 sps:$4 sm:$0xff]   ;;  %v1876_v50 = vld [vmem:[%s2482_s4 + $0x60] ss:$8 sps:$4 sm:$0xff]   ;;  %s1628_s22 = sshll.u32 %s2488_s9, 3 }
   0xf   : > { %s301_s13 = scalar_lea.vmem %s2478_s0, %s1626_s10  ;;  %655 = vmatpush1.bf16.msra.mxu1 %v1861_v28  ;;  %v1877_v51 = vld [vmem:[%s2482_s4 + $0x74] ss:$8 sps:$4 sm:$0xff]   ;;  %v1879_v52 = vld [vmem:[%s2482_s4 + $0x70] ss:$8 sps:$4 sm:$0xff]   ;;  %s307_s25 = scalar_lea.vmem %s2486_s8, %s1628_s22 }
  0x10   : > { %v1849_v6 = vld [vmem:[%s301_s13] sm:$0xff]   ;;  %656 = vmatprep.subr.bf16.mxu1 %v1862_v29  ;;  %v1885_v56 = vld [vmem:[%s2483_s5 + $0xc] ss:$16 sps:$4 sm:$0xff]   ;;  %v1883_v28 = vld [vmem:[%s2483_s5 + $0x8] ss:$16 sps:$4 sm:$0xff]  }
  0x11   : > { %1814 = vmatmul.mubr.msk.bf16.vlgmr.msra.gmra.mrb[0].mxu0 %vm325_vm3, %v1849_v6  ;;  %v1880_v54 = vld [vmem:[%s2483_s5] ss:$16 sps:$4 sm:$0xff]   ;;  %v1882_v55 = vld [vmem:[%s2483_s5 + $0x4] ss:$16 sps:$4 sm:$0xff]   ;;  %v1955_v53 = vld [vmem:[%s2483_s5 + $0x188] ss:$16 sps:$4 sm:$0xff]  }
  0x12   : > { %1821 = vmatprep.mubr.msk.bf16.mxu0 %vm2018_vm2, %v2016_v1  ;;  %1818 = vmatpush3.bf16.msra.mxu0 %v1850_v7  ;;  %v1888_v57 = vld [vmem:[%s2483_s5 + $0x24] ss:$16 sps:$4 sm:$0xff]   ;;  %v1886_v58 = vld [vmem:[%s2483_s5 + $0x20] ss:$16 sps:$4 sm:$0xff]  }
  0x13   : > { %1819 = vmatprep.subr.bf16.mxu0 %v2016_v1  ;;  %657 = vmatpush1.bf16.msra.mxu1 %v1864_v30  ;;  %v1894_v59 = vld [vmem:[%s2483_s5 + $0x44] ss:$16 sps:$4 sm:$0xff]   ;;  %v1892_v60 = vld [vmem:[%s2483_s5 + $0x40] ss:$16 sps:$4 sm:$0xff]   ;;  %v1891_v30 = vld [vmem:[%s2483_s5 + $0x2c] ss:$16 sps:$4 sm:$0xff]  }
  0x14   : > { %658 = vmatprep.subr.bf16.mxu1 %v1865_v31  ;;  %v1900_v61 = vld [vmem:[%s2483_s5 + $0x64] ss:$16 sps:$4 sm:$0xff]   ;;  %v1898_v62 = vld [vmem:[%s2483_s5 + $0x60] ss:$16 sps:$4 sm:$0xff]   ;;  %v1889_v31 = vld [vmem:[%s2483_s5 + $0x28] ss:$16 sps:$4 sm:$0xff]  }
  0x15   : > { %v1906_v63 = vld [vmem:[%s2483_s5 + $0x84] ss:$16 sps:$4 sm:$0xff]   ;;  %v1904_v0 = vld [vmem:[%s2483_s5 + $0x80] ss:$16 sps:$4 sm:$0xff]  }
  0x16   : > { %1820 = vmatpush3.bf16.msra.mxu0 %v1851_v8  ;;  %v1910_v2 = vld [vmem:[%s2483_s5 + $0xa0] ss:$16 sps:$4 sm:$0xff]   ;;  %v1918_v3 = vld [vmem:[%s2483_s5 + $0xc4] ss:$16 sps:$4 sm:$0xff]  }
  0x17   : > { %1825 = vmatprep.subr.bf16.mxu0 %v2016_v1  ;;  %659 = vmatpush1.bf16.msra.mxu1 %v1867_v32  ;;  %v1916_v4 = vld [vmem:[%s2483_s5 + $0xc0] ss:$16 sps:$4 sm:$0xff]   ;;  %v1924_v5 = vld [vmem:[%s2483_s5 + $0xe4] ss:$16 sps:$4 sm:$0xff]   ;;  %v1897_v32 = vld [vmem:[%s2483_s5 + $0x4c] ss:$16 sps:$4 sm:$0xff]  }
  0x18   : > { %660 = vmatprep.subr.bf16.mxu1 %v1868_v33  ;;  %v1922_v6 = vld [vmem:[%s2483_s5 + $0xe0] ss:$16 sps:$4 sm:$0xff]   ;;  %v1930_v7 = vld [vmem:[%s2483_s5 + $0x104] ss:$16 sps:$4 sm:$0xff]   ;;  %v1895_v33 = vld [vmem:[%s2483_s5 + $0x48] ss:$16 sps:$4 sm:$0xff]  }
  0x19   : > { %v1928_v8 = vld [vmem:[%s2483_s5 + $0x100] ss:$16 sps:$4 sm:$0xff]  }
  0x1b   : > { %661 = vmatpush1.bf16.msra.mxu1 %v1870_v34  ;;  %v1903_v34 = vld [vmem:[%s2483_s5 + $0x6c] ss:$16 sps:$4 sm:$0xff]  }
  0x1c   : > { %662 = vmatprep.subr.bf16.mxu1 %v1871_v35  ;;  %v1901_v35 = vld [vmem:[%s2483_s5 + $0x68] ss:$16 sps:$4 sm:$0xff]  }
  0x1f   : > { %663 = vmatpush1.bf16.msra.mxu1 %v1873_v48  ;;  %v1945_v48 = vld [vmem:[%s2483_s5 + $0x14c] ss:$16 sps:$4 sm:$0xff]  }
  0x20   : > { %664 = vmatprep.subr.bf16.mxu1 %v1874_v49  ;;  %v1943_v49 = vld [vmem:[%s2483_s5 + $0x148] ss:$16 sps:$4 sm:$0xff]  }
  0x23   : > { %665 = vmatpush1.bf16.msra.mxu1 %v1876_v50  ;;  %v1951_v50 = vld [vmem:[%s2483_s5 + $0x16c] ss:$16 sps:$4 sm:$0xff]  }
  0x24   : > { %666 = vmatprep.subr.bf16.mxu1 %v1877_v51  ;;  %v1949_v51 = vld [vmem:[%s2483_s5 + $0x168] ss:$16 sps:$4 sm:$0xff]  }
  0x27   : > { %667 = vmatpush1.bf16.msra.mxu1 %v1879_v52  ;;  %v1957_v52 = vld [vmem:[%s2483_s5 + $0x18c] ss:$16 sps:$4 sm:$0xff]  }
  0x28   : > { %1154 = vmatprep.subr.bf16.mxu1 %v1885_v56  ;;  %v1958_v56 = vld [vmem:[%s2483_s5 + $0x1a0] ss:$16 sps:$4 sm:$0xff]  }
  0xe4   : > { %v370_v10 = vpop.f32.mrb[0].mxu0 }
  0xe5   : > { %v371_v11 = vadd.f32 %v1629_v9, %v370_v10  ;;  %v1815_v12 = vpop.f32.mrb[1].mxu0  ;;  %v1934_v10 = vld [vmem:[%s2483_s5 + $0x120] ss:$16 sps:$4 sm:$0xff]  }
  0xe6   : > { %v373_v13 = vpop.f32.mrb[2].mxu0  ;;  %v1940_v12 = vld [vmem:[%s2483_s5 + $0x140] ss:$16 sps:$4 sm:$0xff]  }
  0xe7   : > { %v377_v14 = vmul.f32 0.01, %v371_v11  ;;  %v374_v15 = vadd.f32 %v1629_v9, %v373_v13  ;;  %v1816_v16 = vpop.f32.mrb[3].mxu0  ;;  %v1936_v9 = vld [vmem:[%s2483_s5 + $0x124] ss:$16 sps:$4 sm:$0xff]  }
  0xe8   : > { %v1948_v13 = vld [vmem:[%s2483_s5 + $0x164] ss:$16 sps:$4 sm:$0xff]   ;;  %v1952_v16 = vld [vmem:[%s2483_s5 + $0x180] ss:$16 sps:$4 sm:$0xff]  }
  0xe9   : > { %v378_v17 = vmul.f32 0.01, %v374_v15  ;;  %v379_v18 = vmax.f32 %v371_v11, %v377_v14  ;;  %v1942_v11 = vld [vmem:[%s2483_s5 + $0x144] ss:$16 sps:$4 sm:$0xff]   ;;  %v1946_v14 = vld [vmem:[%s2483_s5 + $0x160] ss:$16 sps:$4 sm:$0xff]  }
  0xeb   : > { %v380_v19 = vmax.f32 %v374_v15, %v378_v17  ;;  %v1954_v15 = vld [vmem:[%s2483_s5 + $0x184] ss:$16 sps:$4 sm:$0xff]   ;;  %v1636_v17 = vld [vmem:[%s2485_s7 + $0x2] ss:$0 sm:$0xff] }
  0xed   : > { %v381_v21 = vpack.c.bf16 %v380_v19, %v379_v18 }
  0xef   : > { %1822 = vmatmul.mubr.msk.bf16.vlgmr.msra.gmra.mrb[4].mxu0 %vm405_vm4, %v381_v21 }
  0xf0   : > { %1826 = vmatpush3.bf16.msra.mxu0 %v1852_v20  ;;  %1833 = vmatprep.mubr.msk.bf16.mxu0 %vm2018_vm2, %v2016_v1 }
  0xf1   : > { %1827 = vmatprep.subr.bf16.mxu0 %v2016_v1 }
  0xf4   : > { %1828 = vmatpush3.bf16.msra.mxu0 %v1853_v22 }
  0xf5   : > { %1829 = vmatprep.subr.bf16.mxu0 %v2016_v1 }
  0xf8   : > { %1830 = vmatpush3.bf16.msra.mxu0 %v1854_v23 }
  0xf9   : > { %1831 = vmatprep.subr.bf16.mxu0 %v2016_v1  ;;  %v1912_v1 = vld [vmem:[%s2483_s5 + $0xa4] ss:$16 sps:$4 sm:$0xff]  }
  0xfc   : > { %1832 = vmatpush3.bf16.msra.mxu0 %v1855_v24 }
  0xfd   : > { %1111 = vmatprep.subr.bf16.mxu0 %v1882_v55  ;;  %v1963_v55 = vld [vmem:[%s2483_s5 + $0x1ac] ss:$16 sps:$4 sm:$0xff]  }
 0x1c2   : > { %v443_v37 = vpop.f32.mrb[4].mxu0 }
 0x1c3   : > { %v444_v38 = vadd.f32 %v1632_v36, %v443_v37  ;;  %v1823_v39 = vpop.f32.mrb[5].mxu0  ;;  %v1907_v37 = vld [vmem:[%s2483_s5 + $0x88] ss:$16 sps:$4 sm:$0xff]  }
 0x1c4   : > { %v446_v40 = vpop.f32.mrb[6].mxu0  ;;  %v1913_v39 = vld [vmem:[%s2483_s5 + $0xa8] ss:$16 sps:$4 sm:$0xff]  }
 0x1c5   : > { %v450_v41 = vmul.f32 0.01, %v444_v38  ;;  %v447_v42 = vadd.f32 %v1632_v36, %v446_v40  ;;  %v1824_v43 = vpop.f32.mrb[7].mxu0  ;;  %v1909_v36 = vld [vmem:[%s2483_s5 + $0x8c] ss:$16 sps:$4 sm:$0xff]  }
 0x1c6   : > { %v1921_v40 = vld [vmem:[%s2483_s5 + $0xcc] ss:$16 sps:$4 sm:$0xff]   ;;  %v1925_v43 = vld [vmem:[%s2483_s5 + $0xe8] ss:$16 sps:$4 sm:$0xff]  }
 0x1c7   : > { %v451_v44 = vmul.f32 0.01, %v447_v42  ;;  %v452_v45 = vmax.f32 %v444_v38, %v450_v41  ;;  %v1915_v38 = vld [vmem:[%s2483_s5 + $0xac] ss:$16 sps:$4 sm:$0xff]   ;;  %v1919_v41 = vld [vmem:[%s2483_s5 + $0xc8] ss:$16 sps:$4 sm:$0xff]  }
 0x1c9   : > { %v453_v46 = vmax.f32 %v447_v42, %v451_v44  ;;  %v1927_v42 = vld [vmem:[%s2483_s5 + $0xec] ss:$16 sps:$4 sm:$0xff]  }
 0x1ca   : > { %v1933_v44 = vld [vmem:[%s2483_s5 + $0x10c] ss:$16 sps:$4 sm:$0xff]  }
 0x1cb   : > { %v454_v47 = vpack.c.bf16 %v453_v46, %v452_v45  ;;  %v1931_v45 = vld [vmem:[%s2483_s5 + $0x108] ss:$16 sps:$4 sm:$0xff]   ;;  %v1939_v46 = vld [vmem:[%s2483_s5 + $0x12c] ss:$16 sps:$4 sm:$0xff]  }
 0x1cd   : > { %1834 = vmatmul.mubr.msk.bf16.vlgmr.msra.gmra.mrb[8].mxu0 %vm494_vm5, %v454_v47  ;;  %v1937_v47 = vld [vmem:[%s2483_s5 + $0x128] ss:$16 sps:$4 sm:$0xff]  }
 0x1ce   : > { %1112 = vmatpush1.bf16.msra.mxu0 %v1880_v54  ;;  %v1960_v54 = vld [vmem:[%s2483_s5 + $0x1a4] ss:$16 sps:$4 sm:$0xff]  }
 0x1cf   : > { %1113 = vmatprep.subr.bf16.mxu0 %v1888_v57  ;;  %v1961_v57 = vld [vmem:[%s2483_s5 + $0x1a8] ss:$16 sps:$4 sm:$0xff]  }
 0x1d2   : > { %1114 = vmatpush1.bf16.msra.mxu0 %v1886_v58  ;;  %v1966_v58 = vld [vmem:[%s2483_s5 + $0x1c4] ss:$16 sps:$4 sm:$0xff]  }
 0x1d3   : > { %1115 = vmatprep.subr.bf16.mxu0 %v1894_v59  ;;  %v1969_v59 = vld [vmem:[%s2483_s5 + $0x1cc] ss:$16 sps:$4 sm:$0xff]  }
 0x1d6   : > { %1116 = vmatpush1.bf16.msra.mxu0 %v1892_v60  ;;  %v1964_v60 = vld [vmem:[%s2483_s5 + $0x1c0] ss:$16 sps:$4 sm:$0xff]  }
 0x1d7   : > { %1117 = vmatprep.subr.bf16.mxu0 %v1900_v61  ;;  %v1967_v61 = vld [vmem:[%s2483_s5 + $0x1c8] ss:$16 sps:$4 sm:$0xff]  }
 0x1da   : > { %1118 = vmatpush1.bf16.msra.mxu0 %v1898_v62  ;;  %v1972_v62 = vld [vmem:[%s2483_s5 + $0x1e4] ss:$16 sps:$4 sm:$0xff]  }
 0x1db   : > { %1119 = vmatprep.subr.bf16.mxu0 %v1906_v63  ;;  %v1975_v63 = vld [vmem:[%s2483_s5 + $0x1ec] ss:$16 sps:$4 sm:$0xff]  }
 0x1de   : > { %1120 = vmatpush1.bf16.msra.mxu0 %v1904_v0  ;;  %v1970_v0 = vld [vmem:[%s2483_s5 + $0x1e0] ss:$16 sps:$4 sm:$0xff]  }
 0x1df   : > { %1121 = vmatprep.subr.bf16.mxu0 %v1912_v1  ;;  %v1973_v1 = vld [vmem:[%s2483_s5 + $0x1e8] ss:$16 sps:$4 sm:$0xff]  }
 0x1e2   : > { %1122 = vmatpush1.bf16.msra.mxu0 %v1910_v2  ;;  %v1976_v2 = vld [vmem:[%s2484_s6 + $0x40] sm:$0xff]  }
 0x1e3   : > { %1123 = vmatprep.subr.bf16.mxu0 %v1918_v3  ;;  %v1977_v3 = vld [vmem:[%s2484_s6 + $0xc0] sm:$0xff]  }
 0x1e6   : > { %1124 = vmatpush1.bf16.msra.mxu0 %v1916_v4  ;;  %v562_v4 = vlaneseq }
 0x1e7   : > { %1125 = vmatprep.subr.bf16.mxu0 %v1924_v5 }
 0x1e8   : > { %v2358_v5 = vshrl.u32 %v562_v4, 7 }
 0x1ea   : > { %1126 = vmatpush1.bf16.msra.mxu0 %v1922_v6  ;;  %v564_v6 = vsub.s32 0, %v2358_v5 }
 0x1eb   : > { %1127 = vmatprep.subr.bf16.mxu0 %v1930_v7  ;;  %v560_v7 = vld [vmem:[%s2485_s7 + $0x3] sm:$0x3] }
 0x1ee   : > { %1128 = vmatpush1.bf16.msra.mxu0 %v1928_v8  ;;  %v568_v8 = vsub.s32 1, %v2358_v5 }
 0x1ef   : > { %1129 = vmatprep.subr.bf16.mxu0 %v1936_v9  ;;  %v565_v9 = vrot.slane %v560_v7, %v564_v6 }
 0x1f2   : > { %1130 = vmatpush1.bf16.msra.mxu0 %v1934_v10  ;;  %v569_v10 = vrot.slane %v560_v7, %v568_v8 }
 0x1f3   : > { %1131 = vmatprep.subr.bf16.mxu0 %v1942_v11 }
 0x1f6   : > { %1132 = vmatpush1.bf16.msra.mxu0 %v1940_v12 }
 0x1f7   : > { %1133 = vmatprep.subr.bf16.mxu0 %v1948_v13 }
 0x1fa   : > { %1134 = vmatpush1.bf16.msra.mxu0 %v1946_v14 }
 0x1fb   : > { %1135 = vmatprep.subr.bf16.mxu0 %v1954_v15 }
 0x1fe   : > { %1136 = vmatpush1.bf16.msra.mxu0 %v1952_v16 }
 0x1ff   : > { %1137 = vmatprep.subr.bf16.mxu0 %v1960_v54  ;;  %v2003_v54 = vld [vmem:[%s2484_s6 + $0xb0] sm:$0xff]  }
 0x202   : > { %1138 = vmatpush1.bf16.msra.mxu0 %v1958_v56  ;;  %v2005_v56 = vld [vmem:[%s2484_s6 + $0xf8] sm:$0xff]  }
 0x203   : > { %1139 = vmatprep.subr.bf16.mxu0 %v1966_v58  ;;  %v2007_v58 = vld [vmem:[%s2484_s6 + $0xb8] sm:$0xff]  }
 0x206   : > { %1140 = vmatpush1.bf16.msra.mxu0 %v1964_v60  ;;  %v769_v60 = vld [vmem:[%s2485_s7 + $0x5] sm:$0xf] }
 0x207   : > { %1141 = vmatprep.subr.bf16.mxu0 %v1972_v62  ;;  %v774_v62 = vrot.slane %v769_v60, %v564_v6 }
 0x20a   : > { %1142 = vmatpush1.bf16.msra.mxu0 %v1970_v0  ;;  %v778_v0 = vrot.slane %v769_v60, %v568_v8 }
 0x20b   : > { %1767 = vmatprep.subr.bf16.mxu0 %v1976_v2 }
 0x2a0   : > { %v532_v18 = vpop.f32.mrb[8].mxu0 }
 0x2a1   : > { %v533_v19 = vadd.f32 %v1636_v17, %v532_v18  ;;  %v1835_v20 = vpop.f32.mrb[9].mxu0 }
 0x2a2   : > { %v535_v21 = vpop.f32.mrb[10].mxu0 }
 0x2a3   : > { %v539_v22 = vmul.f32 0.01, %v533_v19  ;;  %v536_v23 = vadd.f32 %v1636_v17, %v535_v21  ;;  %v1836_v24 = vpop.f32.mrb[11].mxu0 }
 0x2a5   : > { %v540_v25 = vmul.f32 0.01, %v536_v23  ;;  %v541_v26 = vmax.f32 %v533_v19, %v539_v22 }
 0x2a7   : > { %v542_v27 = vmax.f32 %v536_v23, %v540_v25 }
 0x2a9   : > { %v543_v29 = vpack.c.bf16 %v542_v27, %v541_v26 }
 0x2ab   : > { %685 = vmatmul.mubr.bf16.vlgmr.msra.gmra.mrb[0].mxu1 %v543_v29  ;;  %v1978_v29 = vld [vmem:[%s2484_s6] sm:$0xff]  }
 0x2ac   : > { %1155 = vmatpush1.bf16.msra.mxu1 %v1883_v28 }
 0x2ad   : > { %1156 = vmatprep.subr.bf16.mxu1 %v1891_v30  ;;  %v1979_v30 = vld [vmem:[%s2484_s6 + $0x80] sm:$0xff]  }
 0x2b0   : > { %1157 = vmatpush1.bf16.msra.mxu1 %v1889_v31  ;;  %v1980_v31 = vld [vmem:[%s2484_s6 + $0x48] sm:$0xff]  }
 0x2b1   : > { %1158 = vmatprep.subr.bf16.mxu1 %v1897_v32  ;;  %v1981_v32 = vld [vmem:[%s2484_s6 + $0xc8] sm:$0xff]  }
 0x2b4   : > { %1159 = vmatpush1.bf16.msra.mxu1 %v1895_v33  ;;  %v1982_v33 = vld [vmem:[%s2484_s6 + $0x8] sm:$0xff]  }
 0x2b5   : > { %1160 = vmatprep.subr.bf16.mxu1 %v1903_v34  ;;  %v1983_v34 = vld [vmem:[%s2484_s6 + $0x88] sm:$0xff]  }
 0x2b8   : > { %1161 = vmatpush1.bf16.msra.mxu1 %v1901_v35  ;;  %v1984_v35 = vld [vmem:[%s2484_s6 + $0x50] sm:$0xff]  }
 0x2b9   : > { %1162 = vmatprep.subr.bf16.mxu1 %v1909_v36  ;;  %v1985_v36 = vld [vmem:[%s2484_s6 + $0xd0] sm:$0xff]  }
 0x2bc   : > { %1163 = vmatpush1.bf16.msra.mxu1 %v1907_v37  ;;  %v1986_v37 = vld [vmem:[%s2484_s6 + $0x10] sm:$0xff]  }
 0x2bd   : > { %1164 = vmatprep.subr.bf16.mxu1 %v1915_v38  ;;  %v1987_v38 = vld [vmem:[%s2484_s6 + $0x90] sm:$0xff]  }
 0x2c0   : > { %1165 = vmatpush1.bf16.msra.mxu1 %v1913_v39  ;;  %v1988_v39 = vld [vmem:[%s2484_s6 + $0x58] sm:$0xff]  }
 0x2c1   : > { %1166 = vmatprep.subr.bf16.mxu1 %v1921_v40  ;;  %v1989_v40 = vld [vmem:[%s2484_s6 + $0xd8] sm:$0xff]  }
 0x2c4   : > { %1167 = vmatpush1.bf16.msra.mxu1 %v1919_v41  ;;  %v1990_v41 = vld [vmem:[%s2484_s6 + $0x18] sm:$0xff]  }
 0x2c5   : > { %1168 = vmatprep.subr.bf16.mxu1 %v1927_v42  ;;  %v1991_v42 = vld [vmem:[%s2484_s6 + $0x98] sm:$0xff]  }
 0x2c8   : > { %1169 = vmatpush1.bf16.msra.mxu1 %v1925_v43  ;;  %v1992_v43 = vld [vmem:[%s2484_s6 + $0x60] sm:$0xff]  }
 0x2c9   : > { %1170 = vmatprep.subr.bf16.mxu1 %v1933_v44  ;;  %v1993_v44 = vld [vmem:[%s2484_s6 + $0xe0] sm:$0xff]  }
 0x2cc   : > { %1171 = vmatpush1.bf16.msra.mxu1 %v1931_v45  ;;  %v1994_v45 = vld [vmem:[%s2484_s6 + $0x20] sm:$0xff]  }
 0x2cd   : > { %1172 = vmatprep.subr.bf16.mxu1 %v1939_v46  ;;  %v1995_v46 = vld [vmem:[%s2484_s6 + $0xa0] sm:$0xff]  }
 0x2d0   : > { %1173 = vmatpush1.bf16.msra.mxu1 %v1937_v47  ;;  %v1996_v47 = vld [vmem:[%s2484_s6 + $0x68] sm:$0xff]  }
 0x2d1   : > { %1174 = vmatprep.subr.bf16.mxu1 %v1945_v48  ;;  %v1997_v48 = vld [vmem:[%s2484_s6 + $0xe8] sm:$0xff]  }
 0x2d4   : > { %1175 = vmatpush1.bf16.msra.mxu1 %v1943_v49  ;;  %v1998_v49 = vld [vmem:[%s2484_s6 + $0x28] sm:$0xff]  }
 0x2d5   : > { %1176 = vmatprep.subr.bf16.mxu1 %v1951_v50  ;;  %v1999_v50 = vld [vmem:[%s2484_s6 + $0xa8] sm:$0xff]  }
 0x2d8   : > { %1177 = vmatpush1.bf16.msra.mxu1 %v1949_v51  ;;  %v2000_v51 = vld [vmem:[%s2484_s6 + $0x70] sm:$0xff]  }
 0x2d9   : > { %1178 = vmatprep.subr.bf16.mxu1 %v1957_v52  ;;  %v2001_v52 = vld [vmem:[%s2484_s6 + $0xf0] sm:$0xff]  }
 0x2dc   : > { %1179 = vmatpush1.bf16.msra.mxu1 %v1955_v53  ;;  %v2002_v53 = vld [vmem:[%s2484_s6 + $0x30] sm:$0xff]  }
 0x2dd   : > { %1180 = vmatprep.subr.bf16.mxu1 %v1963_v55  ;;  %v2004_v55 = vld [vmem:[%s2484_s6 + $0x78] sm:$0xff]  }
 0x2e0   : > { %1181 = vmatpush1.bf16.msra.mxu1 %v1961_v57  ;;  %v2006_v57 = vld [vmem:[%s2484_s6 + $0x38] sm:$0xff]  }
 0x2e1   : > { %1182 = vmatprep.subr.bf16.mxu1 %v1969_v59  ;;  %v781_v59 = vsub.s32 2, %v2358_v5 }
 0x2e4   : > { %1183 = vmatpush1.bf16.msra.mxu1 %v1967_v61  ;;  %v785_v61 = vsub.s32 3, %v2358_v5 }
 0x2e5   : > { %1184 = vmatprep.subr.bf16.mxu1 %v1975_v63  ;;  %v782_v63 = vrot.slane %v769_v60, %v781_v59 }
 0x2e8   : > { %1185 = vmatpush1.bf16.msra.mxu1 %v1973_v1  ;;  %v786_v1 = vrot.slane %v769_v60, %v785_v61 }
 0x2e9   : > { %1789 = vmatprep.subr.bf16.mxu1 %v1977_v3 }
 0x37e   : > { %v686_v11 = vpop.f32.mrb[0].mxu1 }
 0x37f   : > { %v687_v12 = vadd.f32 %v686_v11, %v565_v9  ;;  %v688_v13 = vpop.f32.mrb[1].mxu1 }
 0x380   : > { %v689_v14 = vadd.f32 %v688_v13, %v569_v10  ;;  %v690_v15 = vpop.f32.mrb[2].mxu1 }
 0x381   : > { %v695_v16 = vmul.f32 0.01, %v687_v12  ;;  %v691_v17 = vadd.f32 %v690_v15, %v565_v9  ;;  %v692_v18 = vpop.f32.mrb[3].mxu1 }
 0x382   : > { %v696_v19 = vmul.f32 0.01, %v689_v14  ;;  %v693_v20 = vadd.f32 %v692_v18, %v569_v10 }
 0x383   : > { %v697_v21 = vmul.f32 0.01, %v691_v17  ;;  %v699_v23 = vmax.f32 %v687_v12, %v695_v16 }
 0x384   : > { %v698_v22 = vmul.f32 0.01, %v693_v20  ;;  %v700_v25 = vmax.f32 %v689_v14, %v696_v19 }
 0x385   : > { %v701_v24 = vmax.f32 %v691_v17, %v697_v21 }
 0x386   : > { %v702_v26 = vmax.f32 %v693_v20, %v698_v22 }
 0x387   : > { %v703_v27 = vpack.c.bf16 %v701_v24, %v699_v23 }
 0x388   : > { %v704_v28 = vpack.c.bf16 %v702_v26, %v700_v25 }
 0x38a   : > { %1143 = vmatprep.mubr.bf16.mxu0 %v704_v28  ;;  %1186 = vmatprep.mubr.bf16.mxu1 %v704_v28 }
 0x38b   : > { %1144 = vmatmul.mubr.bf16.vlgmr.msra.gmra.mrb[12].mxu0 %v703_v27  ;;  %1187 = vmatmul.mubr.bf16.vlgmr.msra.gmra.mrb[4].mxu1 %v703_v27 }
 0x38c   : > { %1768 = vmatpush3.bf16.msra.mxu0 %v1978_v29  ;;  %1790 = vmatpush3.bf16.msra.mxu1 %v1979_v30 }
 0x38d   : > { %1769 = vmatprep.subr.bf16.mxu0 %v1980_v31  ;;  %1791 = vmatprep.subr.bf16.mxu1 %v1981_v32 }
 0x390   : > { %1770 = vmatpush3.bf16.msra.mxu0 %v1982_v33  ;;  %1792 = vmatpush3.bf16.msra.mxu1 %v1983_v34 }
 0x391   : > { %1771 = vmatprep.subr.bf16.mxu0 %v1984_v35  ;;  %1793 = vmatprep.subr.bf16.mxu1 %v1985_v36 }
 0x394   : > { %1772 = vmatpush3.bf16.msra.mxu0 %v1986_v37  ;;  %1794 = vmatpush3.bf16.msra.mxu1 %v1987_v38 }
 0x395   : > { %1773 = vmatprep.subr.bf16.mxu0 %v1988_v39  ;;  %1795 = vmatprep.subr.bf16.mxu1 %v1989_v40  ;;  %v1722_v40 = vld [vmem:[%s2485_s7 + $0x9] ss:$0 sm:$0xff] }
 0x398   : > { %1774 = vmatpush3.bf16.msra.mxu0 %v1990_v41  ;;  %1796 = vmatpush3.bf16.msra.mxu1 %v1991_v42 }
 0x399   : > { %1775 = vmatprep.subr.bf16.mxu0 %v1992_v43  ;;  %1797 = vmatprep.subr.bf16.mxu1 %v1993_v44 }
 0x39c   : > { %1776 = vmatpush3.bf16.msra.mxu0 %v1994_v45  ;;  %1798 = vmatpush3.bf16.msra.mxu1 %v1995_v46 }
 0x39d   : > { %1777 = vmatprep.subr.bf16.mxu0 %v1996_v47  ;;  %1799 = vmatprep.subr.bf16.mxu1 %v1997_v48 }
 0x3a0   : > { %1778 = vmatpush3.bf16.msra.mxu0 %v1998_v49  ;;  %1800 = vmatpush3.bf16.msra.mxu1 %v1999_v50 }
 0x3a1   : > { %1779 = vmatprep.subr.bf16.mxu0 %v2000_v51  ;;  %1801 = vmatprep.subr.bf16.mxu1 %v2001_v52 }
 0x3a4   : > { %1780 = vmatpush3.bf16.msra.mxu0 %v2002_v53  ;;  %1802 = vmatpush3.bf16.msra.mxu1 %v2003_v54 }
 0x3a5   : > { %1781 = vmatprep.subr.bf16.mxu0 %v2004_v55  ;;  %1803 = vmatprep.subr.bf16.mxu1 %v2005_v56 }
 0x3a8   : > { %1782 = vmatpush3.bf16.msra.mxu0 %v2006_v57  ;;  %1804 = vmatpush3.bf16.msra.mxu1 %v2007_v58 }
 0x45e   : > { %v1145_v2 = vpop.f32.mrb[12].mxu0  ;;  %v1188_v3 = vpop.f32.mrb[4].mxu1 }
 0x45f   : > { %v1146_v4 = vadd.f32 %v1145_v2, %v774_v62  ;;  %v1189_v7 = vadd.f32 %v1188_v3, %v782_v63  ;;  %v1147_v9 = vpop.f32.mrb[13].mxu0  ;;  %v1190_v10 = vpop.f32.mrb[5].mxu1 }
 0x460   : > { %v1148_v11 = vadd.f32 %v1147_v9, %v778_v0  ;;  %v1191_v12 = vadd.f32 %v1190_v10, %v786_v1  ;;  %v1149_v13 = vpop.f32.mrb[14].mxu0  ;;  %v1192_v14 = vpop.f32.mrb[6].mxu1 }
 0x461   : > { %v1197_v15 = vmul.f32 0.01, %v1146_v4  ;;  %v1199_v16 = vmul.f32 0.01, %v1189_v7  ;;  %v1150_v17 = vadd.f32 %v1149_v13, %v774_v62  ;;  %v1193_v18 = vadd.f32 %v1192_v14, %v782_v63  ;;  %v1151_v6 = vpop.f32.mrb[15].mxu0  ;;  %v1194_v19 = vpop.f32.mrb[7].mxu1 }
 0x462   : > { %v1198_v20 = vmul.f32 0.01, %v1148_v11  ;;  %v1200_v5 = vmul.f32 0.01, %v1191_v12  ;;  %v1152_v8 = vadd.f32 %v1151_v6, %v778_v0  ;;  %v1195_v21 = vadd.f32 %v1194_v19, %v786_v1 }
 0x463   : > { %v1201_v22 = vmul.f32 0.01, %v1150_v17  ;;  %v1203_v23 = vmul.f32 0.01, %v1193_v18  ;;  %v1205_v26 = vmax.f32 %v1146_v4, %v1197_v15  ;;  %v1207_v27 = vmax.f32 %v1189_v7, %v1199_v16 }
 0x464   : > { %v1202_v24 = vmul.f32 0.01, %v1152_v8  ;;  %v1204_v25 = vmul.f32 0.01, %v1195_v21  ;;  %v1206_v30 = vmax.f32 %v1148_v11, %v1198_v20  ;;  %v1208_v31 = vmax.f32 %v1191_v12, %v1200_v5 }
 0x465   : > { %v1209_v28 = vmax.f32 %v1150_v17, %v1201_v22  ;;  %v1211_v29 = vmax.f32 %v1193_v18, %v1203_v23 }
 0x466   : > { %v1210_v32 = vmax.f32 %v1152_v8, %v1202_v24  ;;  %v1212_v33 = vmax.f32 %v1195_v21, %v1204_v25 }
 0x467   : > { %v1213_v34 = vpack.c.bf16 %v1209_v28, %v1205_v26  ;;  %v1215_v35 = vpack.c.bf16 %v1211_v29, %v1207_v27 }
 0x468   : > { %v1214_v36 = vpack.c.bf16 %v1210_v32, %v1206_v30  ;;  %v1216_v37 = vpack.c.bf16 %v1212_v33, %v1208_v31 }
 0x46a   : > { %1512 = vmatprep.mubr.bf16.mxu0 %v1214_v36  ;;  %1553 = vmatprep.mubr.bf16.mxu1 %v1216_v37 }
 0x46b   : > { %1513 = vmatmul.mubr.bf16.vlgmr.msra.gmra.mrb[16].mxu0 %v1213_v34  ;;  %1554 = vmatmul.mubr.bf16.vlgmr.msra.gmra.mrb[8].mxu1 %v1215_v35 }
 0x53e   : > { %v1783_v38 = vpop.f32.mrb[16].mxu0  ;;  %v1805_v39 = vpop.f32.mrb[8].mxu1 }
 0x53f   : > { %v1784_v41 = vpop.f32.mrb[17].mxu0  ;;  %v1806_v42 = vpop.f32.mrb[9].mxu1 }
 0x540   : > { %v1785_v43 = vadd.f32 %v1784_v41, %v1783_v38  ;;  %v1807_v44 = vadd.f32 %v1806_v42, %v1805_v39  ;;  %v1786_v45 = vpop.f32.mrb[18].mxu0  ;;  %v1808_v46 = vpop.f32.mrb[10].mxu1 }
 0x541   : > { %v1787_v47 = vpop.f32.mrb[19].mxu0  ;;  %v1809_v48 = vpop.f32.mrb[11].mxu1 }
 0x542   : > { %v1515_v49 = vadd.f32 %v1785_v43, %v1722_v40  ;;  %v1788_v50 = vadd.f32 %v1787_v47, %v1786_v45  ;;  %v1810_v51 = vadd.f32 %v1809_v48, %v1808_v46 }
 0x544   : > { %v1556_v52 = vadd.f32 %v1807_v44, %v1515_v49  ;;  %v1518_v53 = vadd.f32 %v1788_v50, %v1722_v40 }
 0x546   : > { %1562 = vst [vmem:[%s307_s25] sm:$0xff] %v1556_v52  ;;  %v1559_v54 = vadd.f32 %v1810_v51, %v1518_v53 }
 0x548   : > { %1563 = vst [vmem:[%s307_s25 + $0x8] sm:$0xff] %v1559_v54 }
 0x549 PF: > { %s18_s27 = sadd.s32 1, %s2014_s27  }
 0x54a   : > { %p15_p4 = scmp.ge.s32.totalorder %s18_s27, 4  }
 0x54c   :  { %17 = sbr.rel (!%p15_p4) target bundleno = 1 (0x1), region = 82 }

</bundles_post_ra>
